<compile_context>
chip_gen: v6e
topology: v6e:2x2x1
jax: 0.10.0
libtpu: 0.0.40
codegen_flags: <defaults>
</compile_context>

<pallas_src>
import functools

import jax
import jax.numpy as jnp
from jax.experimental import pallas as pl
from jax.experimental.pallas import tpu as pltpu

LANE = 128
GRANULE = 16          # row granule: safe for bf16 (16,128) and f32 (8,128) tiles


def _round_up(x, m):
    return ((x + m - 1) // m) * m


def _cdiv(a, b):
    return -(-a // b)


def _physical_vmem_bytes():
    """Per-TensorCore physical VMEM (v5e/v6e: 128 MiB, v7x: 64 MiB)."""
    try:
        info = pltpu.get_tpu_info()
        return int(getattr(info, "vmem_capacity_bytes", 64 * 1024 * 1024))
    except Exception:  # pragma: no cover - conservative fallback
        return 64 * 1024 * 1024


def _vmem_need_bytes(tm, hidden, tag_pad):
    """Estimate VMEM for one pipelined grid step (double-buffered I/O tiles,
    double-buffered resident weights -- Pallas' default for revisited blocks)."""
    return (
        2 * tm * hidden * 4                 # x tile, f32, double-buffered
        + 2 * tm * tag_pad * 2              # scores tile, bf16, double-buffered
        + 2 * hidden * hidden * 2           # w1 bf16 (counted double-buffered)
        + 2 * hidden * tag_pad * 2          # w2 bf16 (counted double-buffered)
        + 2 * (hidden + tag_pad) * 4        # biases f32
        + (2 << 20)                         # Mosaic internal scratch margin
    )


def _choose_tm(M, tm_target):
    """Pick a tile height: ~tm_target rows, multiple of GRANULE, padding kept
    below one granule past a tile, and >=2 grid steps when M allows (v7x has
    2 TensorCores that split the 'parallel' M axis)."""
    n_tiles = max(1, _cdiv(M, tm_target))
    if n_tiles == 1 and M > GRANULE:
        n_tiles = 2
    return _round_up(_cdiv(M, n_tiles), GRANULE)


def mention_extractor_kernel(x_ref, w1_ref, b1_ref, w2_ref, b2_ref, scores_ref):
    # x_ref: (TM, H) f32 token tile -> cast to bf16 in-kernel (VPU cast is
    # hidden behind the input DMA; avoids a separate wrapper-side cast pass).
    x = x_ref[...].astype(jnp.bfloat16)

    # Hidden layer: Linear + ReLU (MXU matmul, f32 accumulation, f32 bias).
    h = jnp.dot(x, w1_ref[...], preferred_element_type=jnp.float32)
    h = jnp.maximum(h + b1_ref[...], 0.0)

    # Output layer: Linear -> BIO tag scores (lane-padded to 128 wide),
    # stored as bf16 to halve the dominant HBM writeback stream.
    s = jnp.dot(h.astype(jnp.bfloat16), w2_ref[...],
                preferred_element_type=jnp.float32)
    scores_ref[...] = (s + b2_ref[...]).astype(scores_ref.dtype)


@functools.partial(jax.jit, static_argnames=("tm",))
def mention_extractor_forward(feats, w1, b1, w2, b2, *, tm=2048):
    """feats: (batch, seq, hidden) -> (scores (b,s,T) f32, tags (b,s) i32)."""
    batch, seq, hidden = feats.shape
    tagset_size = w2.shape[1]
    M = batch * seq
    tag_pad = _round_up(max(tagset_size, LANE), LANE)   # lane-dense output

    # ---- Tiling (generation-aware VMEM budget; shrink TM rather than clamp).
    phys_vmem = _physical_vmem_bytes()
    if phys_vmem <= 64 * 1024 * 1024:        # v7x: leave headroom for Mosaic
        vmem_cap = 52 * 1024 * 1024
    else:                                    # v5e/v6e: 128 MiB physical
        vmem_cap = 100 * 1024 * 1024

    TM = _choose_tm(M, tm)
    while _vmem_need_bytes(TM, hidden, tag_pad) > vmem_cap and TM > GRANULE:
        TM = _round_up(TM // 2, GRANULE)
    M_pad = _round_up(M, TM)                 # at most TM-1 (< GRANULE+tm) extra rows
    vmem_limit = int(min(max(_vmem_need_bytes(TM, hidden, tag_pad),
                             32 * 1024 * 1024), vmem_cap))

    # ---- Operand prep: feats stay f32 (cast happens in-kernel); weights bf16,
    # biases f32; tagset padded to 128 lanes.  Tail rows (zero-padded) produce
    # garbage scores (relu(b1)@w2 + b2) and are sliced off below.
    x = feats.reshape(M, hidden)
    if M_pad != M:
        x = jnp.pad(x, ((0, M_pad - M), (0, 0)))
    w1_b = w1.astype(jnp.bfloat16)
    w2_b = jnp.pad(w2, ((0, 0), (0, tag_pad - tagset_size))).astype(jnp.bfloat16)
    b1_2d = b1.reshape(1, hidden).astype(jnp.float32)
    b2_2d = jnp.pad(b2, (0, tag_pad - tagset_size)).reshape(1, tag_pad).astype(jnp.float32)

    cost = pl.CostEstimate(
        flops=2 * M_pad * hidden * (hidden + tag_pad),
        transcendentals=0,
        bytes_accessed=(M_pad * hidden * 4                    # x read (f32)
                        + hidden * (hidden + tag_pad) * 2     # weights read (bf16)
                        + (hidden + tag_pad) * 4              # biases read (f32)
                        + M_pad * tag_pad * 2),               # scores write (bf16)
    )

    scores_pad = pl.pallas_call(
        mention_extractor_kernel,
        out_shape=jax.ShapeDtypeStruct((M_pad, tag_pad), jnp.bfloat16),
        grid=(M_pad // TM,),
        in_specs=[
            pl.BlockSpec((TM, hidden), lambda i: (i, 0)),       # x: tiled over M
            pl.BlockSpec((hidden, hidden), lambda i: (0, 0)),   # w1: VMEM-resident
            pl.BlockSpec((1, hidden), lambda i: (0, 0)),        # b1: resident
            pl.BlockSpec((hidden, tag_pad), lambda i: (0, 0)),  # w2: resident
            pl.BlockSpec((1, tag_pad), lambda i: (0, 0)),       # b2: resident
        ],
        out_specs=pl.BlockSpec((TM, tag_pad), lambda i: (i, 0)),
        compiler_params=pltpu.CompilerParams(
            dimension_semantics=("parallel",),   # v7x: shard M over both TCs
            vmem_limit_bytes=vmem_limit,
        ),
        cost_estimate=cost,
    )(x, w1_b, b1_2d, w2_b, b2_2d)

    # Upcast only the real (M, tagset) slice; argmax over 5 lanes is a trivially
    # small XLA op (keeps lane-sparse masked stores out of the kernel).
    scores = scores_pad[:M, :tagset_size].astype(jnp.float32).reshape(
        batch, seq, tagset_size)
    tags = jnp.argmax(scores, axis=-1).astype(jnp.int32)
    return scores, tags


def reference_forward_kernelmath(feats, w1, b1, w2, b2):
    """Mirrors the kernel numerics: bf16 matmul inputs, f32 accumulation,
    bf16-rounded scores."""
    x = feats.astype(jnp.bfloat16)
    h = jnp.dot(x, w1.astype(jnp.bfloat16), preferred_element_type=jnp.float32) + b1
    h = jnp.maximum(h, 0.0)
    s = jnp.dot(h.astype(jnp.bfloat16), w2.astype(jnp.bfloat16),
                preferred_element_type=jnp.float32) + b2
    s = s.astype(jnp.bfloat16).astype(jnp.float32)
    return s, jnp.argmax(s, axis=-1).astype(jnp.int32)


def reference_forward_f32(feats, w1, b1, w2, b2):
    h = jnp.maximum(feats @ w1 + b1, 0.0)
    s = h @ w2 + b2
    return s, jnp.argmax(s, axis=-1).astype(jnp.int32)


if __name__ == "__main__":
    # Small shapes consistent with the module's forward:
    # feats (batch=2, seq=8, hidden=32); tag_to_ix = {O, B, I, [CLS], [SEP]} -> 5 tags
    batch, seq, hidden, tagset_size = 2, 8, 32, 5

    key = jax.random.PRNGKey(0)
    k_f, k_w1, k_b1, k_w2, k_b2 = jax.random.split(key, 5)

    feats = jax.random.normal(k_f, (batch, seq, hidden), dtype=jnp.float32)
    w1 = jax.random.normal(k_w1, (hidden, hidden), dtype=jnp.float32) * 0.1
    b1 = jax.random.normal(k_b1, (hidden,), dtype=jnp.float32) * 0.01
    w2 = jax.random.normal(k_w2, (hidden, tagset_size), dtype=jnp.float32) * 0.1
    b2 = jax.random.normal(k_b2, (tagset_size,), dtype=jnp.float32) * 0.01

    scores, tags = mention_extractor_forward(feats, w1, b1, w2, b2)
    jax.block_until_ready((scores, tags))

    assert scores.shape == (batch, seq, tagset_size)
    assert tags.shape == (batch, seq)
    assert scores.dtype == jnp.float32 and tags.dtype == jnp.int32

    # Numerics match a bf16-input / f32-accumulation / bf16-output reference.
    ref_s, ref_t = reference_forward_kernelmath(feats, w1, b1, w2, b2)
    assert jnp.allclose(scores, ref_s, atol=2e-2, rtol=2e-2)

    # The chosen tag is (within tolerance) the argmax of the reference scores.
    picked = jnp.take_along_axis(ref_s, tags[..., None], axis=-1)[..., 0]
    assert jnp.all(ref_s.max(axis=-1) - picked <= 2e-2)

    # Fidelity to full-f32 math (PyTorch semantics) within bf16 rounding.
    f32_s, _ = reference_forward_f32(feats, w1, b1, w2, b2)
    assert jnp.allclose(scores, f32_s, atol=6e-2, rtol=6e-2)

    # TODO(synk): compute_loss (masked CrossEntropyLoss) is a training-only path
    # and is not part of forward(); left unimplemented.
    print("KERNEL_OK")
</pallas_src>

<mosaic_0001>
module attributes {stable_mosaic.version = 11 : i64} {
  func.func @mention_extractor_kernel(%arg0: i32, %arg1: memref<16x32xf32, #tpu.memory_space<vmem>>, %arg2: memref<32x32xbf16, #tpu.memory_space<vmem>>, %arg3: memref<1x32xf32, #tpu.memory_space<vmem>>, %arg4: memref<32x128xbf16, #tpu.memory_space<vmem>>, %arg5: memref<1x128xf32, #tpu.memory_space<vmem>>, %arg6: memref<16x128xbf16, #tpu.memory_space<vmem>>) attributes {dimension_semantics = [#tpu.dimension_semantics<parallel>], iteration_bounds = array<i64: 1>, scalar_prefetch = 0 : i64, scratch_operands = 0 : i64, tpu.core_type = #tpu.core_type<tc>, window_params = [{transform_indices = @transform_0, window_bounds = array<i64: 16, 32>}, {pipeline_mode = #tpu.pipeline_mode<synchronous>, transform_indices = @transform_1, window_bounds = array<i64: 32, 32>}, {pipeline_mode = #tpu.pipeline_mode<synchronous>, transform_indices = @transform_2, window_bounds = array<i64: 1, 32>}, {pipeline_mode = #tpu.pipeline_mode<synchronous>, transform_indices = @transform_3, window_bounds = array<i64: 32, 128>}, {pipeline_mode = #tpu.pipeline_mode<synchronous>, transform_indices = @transform_4, window_bounds = array<i64: 1, 128>}, {transform_indices = @transform_5, window_bounds = array<i64: 16, 128>}]} {
    %c0 = arith.constant 0 : index
    %c0_0 = arith.constant 0 : index
    %0 = vector.load %arg1[%c0, %c0_0] : memref<16x32xf32, #tpu.memory_space<vmem>>, vector<16x32xf32>
    %1 = arith.truncf %0 : vector<16x32xf32> to vector<16x32xbf16>
    %c0_1 = arith.constant 0 : index
    %c0_2 = arith.constant 0 : index
    %2 = vector.load %arg2[%c0_1, %c0_2] : memref<32x32xbf16, #tpu.memory_space<vmem>>, vector<32x32xbf16>
    %cst = arith.constant dense<0.000000e+00> : vector<16x32xf32>
    %3 = tpu.matmul %1, %2, %cst {dimension_numbers = #tpu.dot_dimension_numbers<[1], [0], [0], [1], [0, 0, 1, 1], [], []>} : vector<16x32xbf16>, vector<32x32xbf16>, vector<16x32xf32> -> vector<16x32xf32>
    %c0_3 = arith.constant 0 : index
    %c0_4 = arith.constant 0 : index
    %4 = vector.load %arg3[%c0_3, %c0_4] : memref<1x32xf32, #tpu.memory_space<vmem>>, vector<1x32xf32>
    %5 = vector.broadcast %4 : vector<1x32xf32> to vector<16x32xf32>
    %6 = arith.addf %3, %5 : vector<16x32xf32>
    %cst_5 = arith.constant 0.000000e+00 : f32
    %7 = vector.broadcast %cst_5 : f32 to vector<16x32xf32>
    %8 = arith.maximumf %6, %7 : vector<16x32xf32>
    %9 = arith.truncf %8 : vector<16x32xf32> to vector<16x32xbf16>
    %c0_6 = arith.constant 0 : index
    %c0_7 = arith.constant 0 : index
    %10 = vector.load %arg4[%c0_6, %c0_7] : memref<32x128xbf16, #tpu.memory_space<vmem>>, vector<32x128xbf16>
    %cst_8 = arith.constant dense<0.000000e+00> : vector<16x128xf32>
    %11 = tpu.matmul %9, %10, %cst_8 {dimension_numbers = #tpu.dot_dimension_numbers<[1], [0], [0], [1], [0, 0, 1, 1], [], []>} : vector<16x32xbf16>, vector<32x128xbf16>, vector<16x128xf32> -> vector<16x128xf32>
    %c0_9 = arith.constant 0 : index
    %c0_10 = arith.constant 0 : index
    %12 = vector.load %arg5[%c0_9, %c0_10] : memref<1x128xf32, #tpu.memory_space<vmem>>, vector<1x128xf32>
    %13 = vector.broadcast %12 : vector<1x128xf32> to vector<16x128xf32>
    %14 = arith.addf %11, %13 : vector<16x128xf32>
    %15 = arith.truncf %14 : vector<16x128xf32> to vector<16x128xbf16>
    %c0_11 = arith.constant 0 : index
    %c0_12 = arith.constant 0 : index
    %16 = vector.load %arg6[%c0_11, %c0_12] : memref<16x128xbf16, #tpu.memory_space<vmem>>, vector<16x128xbf16>
    tpu.vector_store %arg6[%c0_11, %c0_12], %15 {strides = array<i32>} : memref<16x128xbf16, #tpu.memory_space<vmem>>, vector<16x128xbf16>,
    return
  }
  func.func @transform_0(%arg0: i32) -> (i32, i32) {
    %c0_i32 = arith.constant 0 : i32
    %c0_i32_0 = arith.constant 0 : i32
    return %arg0, %c0_i32 : i32, i32
  }
  func.func @transform_1(%arg0: i32) -> (i32, i32) {
    %c0_i32 = arith.constant 0 : i32
    %c0_i32_0 = arith.constant 0 : i32
    %c0_i32_1 = arith.constant 0 : i32
    return %c0_i32, %c0_i32_0 : i32, i32
  }
  func.func @transform_2(%arg0: i32) -> (i32, i32) {
    %c0_i32 = arith.constant 0 : i32
    %c0_i32_0 = arith.constant 0 : i32
    %c0_i32_1 = arith.constant 0 : i32
    return %c0_i32, %c0_i32_0 : i32, i32
  }
  func.func @transform_3(%arg0: i32) -> (i32, i32) {
    %c0_i32 = arith.constant 0 : i32
    %c0_i32_0 = arith.constant 0 : i32
    %c0_i32_1 = arith.constant 0 : i32
    return %c0_i32, %c0_i32_0 : i32, i32
  }
  func.func @transform_4(%arg0: i32) -> (i32, i32) {
    %c0_i32 = arith.constant 0 : i32
    %c0_i32_0 = arith.constant 0 : i32
    %c0_i32_1 = arith.constant 0 : i32
    return %c0_i32, %c0_i32_0 : i32, i32
  }
  func.func @transform_5(%arg0: i32) -> (i32, i32) {
    %c0_i32 = arith.constant 0 : i32
    %c0_i32_0 = arith.constant 0 : i32
    return %arg0, %c0_i32 : i32, i32
  }
}

</mosaic_0001>

<bundles_post_ra>
// kernel: mention_extractor_forward.1
= control target key start
LH: loop header
LB: loop body
LE: loop exit
PB: predicated region body
PF: predicated region fallthrough
CT: control target
= control target key end

     0   :  { %v221_v0 = vmov 0.0   ;;  %vm222_vm0 = vmmov 0   ;;  %vm47_vm1 = vcmask 261120   ;;  %s282_s1 = inlined_call_operand.vmem [shape: bf16[32,32], index: 1, kind: input, shape index: {}]   ;;  %s283_s0 = inlined_call_operand.vmem [shape: f32[16,32], index: 0, kind: input, shape index: {}]   ;;  %s284_s3 = inlined_call_operand.vmem [shape: bf16[32,128], index: 3, kind: input, shape index: {}]   ;;  %s285_s2 = inlined_call_operand.vmem [shape: f32[1,32], index: 2, kind: input, shape index: {}]   ;;  %s286_s4 = inlined_call_operand.vmem [shape: f32[1,128], index: 4, kind: input, shape index: {}]   ;;  %s287_s5 = inlined_call_operand.vmem [shape: bf16[16,128], index: 5, kind: output, shape index: {}]  }
   0x1   :  { %199 = vmatprep.subr.bf16.mxu0 %v221_v0  ;;  %v217_v1 = vld [vmem:[%s282_s1 + $0x8] sm:$0xff]   ;;  %203 = vmatprep.mubr.msk.bf16.mxu0 %vm222_vm0, %v221_v0  ;;  %v218_v2 = vld [vmem:[%s282_s1] sm:$0xff]  }
   0x2   :  { %207 = vmatprep.subr.bf16.mxu1 %v221_v0  ;;  %211 = vmatprep.mubr.msk.bf16.mxu1 %vm222_vm0, %v221_v0  ;;  %v21_v3 = vld [vmem:[%s283_s0] sm:$0xff]  ;;  %v22_v4 = vld [vmem:[%s283_s0 + $0x8] sm:$0xff] }
   0x3   :  { %200 = vmatpush3.bf16.msra.mxu0 %v217_v1  ;;  %v23_v5 = vpack.c.bf16 %v22_v4, %v21_v3  ;;  %v219_v6 = vld [vmem:[%s284_s3 + $0x8] sm:$0xff]   ;;  %v220_v7 = vld [vmem:[%s284_s3] sm:$0xff]  }
   0x4   :  { %201 = vmatprep.subr.bf16.mxu0 %v221_v0  ;;  %208 = vmatpush3.bf16.msra.mxu1 %v219_v6  ;;  %v176_v8 = vld [vmem:[%s285_s2] ss:$0 sm:$0xff] }
   0x5   :  { %209 = vmatprep.subr.bf16.mxu1 %v221_v0  ;;  %v180_v19 = vld [vmem:[%s286_s4] ss:$0 sm:$0xff] }
   0x7   :  { %202 = vmatpush3.bf16.msra.mxu0 %v218_v2 }
   0x8   :  { %210 = vmatpush3.bf16.msra.mxu1 %v220_v7 }
   0xa   :  { %204 = vmatmul.mubr.msk.bf16.vlgmr.msra.gmra.mxu0 %vm47_vm1, %v23_v5 }
  0xca   :  { %v85_v9 = vpop.f32.mrf.mxu0 }
  0xcb   :  { %v86_v11 = vadd.f32 %v176_v8, %v85_v9 }
  0xcc   :  { %v205_v10 = vpop.f32.mrf.mxu0 }
  0xcd   :  { %v92_v15 = vmax.f32 %v86_v11, 0.0 }
  0xce   :  { %v88_v12 = vpop.f32.mrf.mxu0 }
  0xcf   :  { %v89_v13 = vadd.f32 %v176_v8, %v88_v12 }
  0xd0   :  { %v206_v14 = vpop.f32.mrf.mxu0 }
  0xd1   :  { %v93_v16 = vmax.f32 %v89_v13, 0.0 }
  0xd3   :  { %v94_v17 = vpack.c.bf16 %v93_v16, %v92_v15 }
  0xd5   :  { %212 = vmatmul.mubr.msk.bf16.vlgmr.msra.gmra.mxu1 %vm47_vm1, %v94_v17 }
 0x195   :  { %v155_v18 = vpop.f32.mrf.mxu1 }
 0x196   :  { %v156_v22 = vadd.f32 %v180_v19, %v155_v18 }
 0x197   :  { %v213_v20 = vpop.f32.mrf.mxu1 }
 0x199   :  { %v158_v21 = vpop.f32.mrf.mxu1 }
 0x19a   :  { %v159_v23 = vadd.f32 %v180_v19, %v158_v21 }
 0x19b   :  { %v214_v24 = vpop.f32.mrf.mxu1 }
 0x19c   :  { %v191_v25 = vpack.c.bf16 %v159_v23, %v156_v22 }
 0x19e   :  { %192 = vst [vmem:[%s287_s5] sm:$0xff] %v191_v25  }

</bundles_post_ra>
